<compile_context>
chip_gen: v5e
topology: v5e:2x2
jax: 0.10.0
libtpu: 0.0.40
codegen_flags: <defaults>
</compile_context>

<pallas_src>
import functools

import jax
import jax.numpy as jnp
from jax.experimental import pallas as pl
from jax.experimental.pallas import tpu as pltpu

_LANE = 128     # TPU lane width: hidden dim is zero-padded to this at init
_SUBLANE = 16   # batch tiles (when >1) are kept multiples of this


def _mlp_kernel(x_ref, w1_ref, b1_ref, w2_ref, b2_ref, o_ref):
    """One batch tile of: Linear(S->Hp) -> ReLU -> Linear(Hp->A).

    Matmul inputs are bf16 (native MXU rate on v5e/v6e/v7x); accumulation,
    bias add and ReLU are f32. The x cast happens here, not in the wrapper.
    """
    x = x_ref[...].astype(jnp.bfloat16)                           # in-kernel cast
    h = jnp.dot(x, w1_ref[...], preferred_element_type=jnp.float32)
    h = jnp.maximum(h + b1_ref[...], 0.0)                         # (TB, Hp) f32
    out = jnp.dot(h.astype(jnp.bfloat16), w2_ref[...],
                  preferred_element_type=jnp.float32)             # (TB, A) f32
    o_ref[...] = (out + b2_ref[...]).astype(o_ref.dtype)


def nn_forward(x, params, *, num_batch_tiles=1):
    """Fused forward of NN.

    x:      (batch, state_size) float32
    params: (w1, b1, w2, b2) from init_params(): bf16 weights (hidden dim
            pre-padded to 128 lanes), f32 biases.
    num_batch_tiles: 1 (default, best on v5e/v6e) or 2 (v7x megacore split).
    Returns (batch, action_size) float32 Q-values.
    """
    w1, b1, w2, b2 = params
    batch, state_size = x.shape
    hp = w1.shape[1]                 # padded hidden (128)
    action_size = w2.shape[1]        # true action count (unpadded output)

    # Tile selection: default is 1 grid step. Fall back to a single full-batch
    # tile whenever the requested split isn't evenly sublane-aligned, so the
    # blocks stay either (8,128)-aligned or equal to the full array dims and
    # no HBM padding copy of x is ever needed.
    tiles = int(num_batch_tiles)
    if tiles < 1:
        tiles = 1
    if tiles > 1 and (batch % tiles != 0 or (batch // tiles) % _SUBLANE != 0):
        tiles = 1
    tb = batch // tiles

    flops = 2 * batch * (state_size * hp + hp * action_size)
    bytes_accessed = (x.size * 4 + w1.size * 2 + w2.size * 2
                      + b1.size * 4 + b2.size * 4 + batch * action_size * 4)

    return pl.pallas_call(
        _mlp_kernel,
        out_shape=jax.ShapeDtypeStruct((batch, action_size), jnp.float32),
        grid=(tiles,),
        in_specs=[
            pl.BlockSpec((tb, state_size),  lambda i: (i, 0)),   # x batch tile
            pl.BlockSpec((state_size, hp),  lambda i: (0, 0)),   # w1 (resident)
            pl.BlockSpec((1, hp),           lambda i: (0, 0)),   # b1 (resident)
            pl.BlockSpec((hp, action_size), lambda i: (0, 0)),   # w2 (resident)
            pl.BlockSpec((1, action_size),  lambda i: (0, 0)),   # b2 (resident)
        ],
        out_specs=pl.BlockSpec((tb, action_size), lambda i: (i, 0)),
        compiler_params=pltpu.CompilerParams(
            dimension_semantics=("parallel",)),                  # megacore on v7x
        cost_estimate=pl.CostEstimate(
            flops=flops, transcendentals=0, bytes_accessed=bytes_accessed),
    )(x, w1, b1, w2, b2)


def init_params(key, state_size, action_size, hidden=20):
    """Mirror nn.Linear's U(-1/sqrt(fan_in), 1/sqrt(fan_in)) init, then zero-pad
    the HIDDEN dim to the TPU lane width (128) once, offline:
        w1: (state_size, 128) bf16    b1: (1, 128) f32
        w2: (128, action_size) bf16   b2: (1, action_size) f32
    Padded hidden columns have zero weight and bias (ReLU(0)=0) and the padded
    w2 rows are zero, so the math is identical to the unpadded network. The
    action dim is intentionally NOT padded: the kernel writes only real lanes.
    """
    k1, k2, k3, k4 = jax.random.split(key, 4)
    lim1 = 1.0 / float(state_size) ** 0.5
    lim2 = 1.0 / float(hidden) ** 0.5
    hp = pl.cdiv(hidden, _LANE) * _LANE

    w1 = jax.random.uniform(k1, (state_size, hidden), jnp.float32, -lim1, lim1)
    b1 = jax.random.uniform(k2, (1, hidden), jnp.float32, -lim1, lim1)
    w2 = jax.random.uniform(k3, (hidden, action_size), jnp.float32, -lim2, lim2)
    b2 = jax.random.uniform(k4, (1, action_size), jnp.float32, -lim2, lim2)

    w1p = jnp.zeros((state_size, hp), jnp.bfloat16).at[:, :hidden].set(
        w1.astype(jnp.bfloat16))
    b1p = jnp.zeros((1, hp), jnp.float32).at[:, :hidden].set(b1)
    w2p = jnp.zeros((hp, action_size), jnp.bfloat16).at[:hidden, :].set(
        w2.astype(jnp.bfloat16))
    b2p = b2
    return w1p, b1p, w2p, b2p


if __name__ == "__main__":
    state_size, action_size, hidden = 8, 4, 20
    batch = 32   # small DQN minibatch

    key = jax.random.PRNGKey(0)
    k_x, k_p = jax.random.split(key)
    x = jax.random.normal(k_x, (batch, state_size), jnp.float32)
    params = init_params(k_p, state_size, action_size, hidden)

    def reference(xx, pp):
        # Same bf16-matmul-inputs / f32-accumulation semantics as the kernel.
        w1, b1, w2, b2 = pp
        xq = xx.astype(jnp.bfloat16).astype(jnp.float32)
        h = jnp.maximum(xq @ w1.astype(jnp.float32) + b1, 0.0)
        return (h.astype(jnp.bfloat16).astype(jnp.float32)
                @ w2.astype(jnp.float32) + b2)

    # Default: single grid step (best on v5e/v6e).
    fwd1 = jax.jit(nn_forward)
    out = jax.block_until_ready(fwd1(x, params))
    assert out.shape == (batch, action_size)
    assert jnp.allclose(out, reference(x, params), atol=2e-3, rtol=2e-3)

    # v7x-style split: exactly 2 "parallel" tiles, one per TensorCore.
    fwd2 = jax.jit(functools.partial(nn_forward, num_batch_tiles=2))
    out2 = jax.block_until_ready(fwd2(x, params))
    assert jnp.allclose(out2, out, atol=1e-6, rtol=1e-6)

    # Ragged batch: no wrapper padding needed (block == full array dims).
    x_small = x[:5]
    out_small = jax.block_until_ready(jax.jit(nn_forward)(x_small, params))
    assert out_small.shape == (5, action_size)
    assert jnp.allclose(out_small, reference(x_small, params),
                        atol=2e-3, rtol=2e-3)

    # Loose sanity check against pure-f32 math (bf16 quantization error only).
    w1, b1, w2, b2 = params
    h32 = jnp.maximum(x @ w1.astype(jnp.float32) + b1, 0.0)
    ref32 = h32 @ w2.astype(jnp.float32) + b2
    assert jnp.allclose(out, ref32, atol=5e-2, rtol=5e-2)

    print("KERNEL_OK")
</pallas_src>

<mosaic_0001>
module attributes {stable_mosaic.version = 11 : i64} {
  func.func @_mlp_kernel(%arg0: i32, %arg1: memref<32x8xf32, #tpu.memory_space<vmem>>, %arg2: memref<8x128xbf16, #tpu.memory_space<vmem>>, %arg3: memref<1x128xf32, #tpu.memory_space<vmem>>, %arg4: memref<128x4xbf16, #tpu.memory_space<vmem>>, %arg5: memref<1x4xf32, #tpu.memory_space<vmem>>, %arg6: memref<32x4xf32, #tpu.memory_space<vmem>>) attributes {dimension_semantics = [#tpu.dimension_semantics<parallel>], iteration_bounds = array<i64: 1>, scalar_prefetch = 0 : i64, scratch_operands = 0 : i64, tpu.core_type = #tpu.core_type<tc>, window_params = [{transform_indices = @transform_0, window_bounds = array<i64: 32, 8>}, {pipeline_mode = #tpu.pipeline_mode<synchronous>, transform_indices = @transform_1, window_bounds = array<i64: 8, 128>}, {pipeline_mode = #tpu.pipeline_mode<synchronous>, transform_indices = @transform_2, window_bounds = array<i64: 1, 128>}, {pipeline_mode = #tpu.pipeline_mode<synchronous>, transform_indices = @transform_3, window_bounds = array<i64: 128, 4>}, {pipeline_mode = #tpu.pipeline_mode<synchronous>, transform_indices = @transform_4, window_bounds = array<i64: 1, 4>}, {transform_indices = @transform_5, window_bounds = array<i64: 32, 4>}]} {
    %c0 = arith.constant 0 : index
    %c0_0 = arith.constant 0 : index
    %0 = vector.load %arg1[%c0, %c0_0] : memref<32x8xf32, #tpu.memory_space<vmem>>, vector<32x8xf32>
    %1 = arith.truncf %0 : vector<32x8xf32> to vector<32x8xbf16>
    %c0_1 = arith.constant 0 : index
    %c0_2 = arith.constant 0 : index
    %2 = vector.load %arg2[%c0_1, %c0_2] : memref<8x128xbf16, #tpu.memory_space<vmem>>, vector<8x128xbf16>
    %cst = arith.constant dense<0.000000e+00> : vector<32x128xf32>
    %3 = tpu.matmul %1, %2, %cst {dimension_numbers = #tpu.dot_dimension_numbers<[1], [0], [0], [1], [0, 0, 1, 1], [], []>} : vector<32x8xbf16>, vector<8x128xbf16>, vector<32x128xf32> -> vector<32x128xf32>
    %c0_3 = arith.constant 0 : index
    %c0_4 = arith.constant 0 : index
    %4 = vector.load %arg3[%c0_3, %c0_4] : memref<1x128xf32, #tpu.memory_space<vmem>>, vector<1x128xf32>
    %5 = vector.broadcast %4 : vector<1x128xf32> to vector<32x128xf32>
    %6 = arith.addf %3, %5 : vector<32x128xf32>
    %cst_5 = arith.constant 0.000000e+00 : f32
    %7 = vector.broadcast %cst_5 : f32 to vector<32x128xf32>
    %8 = arith.maximumf %6, %7 : vector<32x128xf32>
    %9 = arith.truncf %8 : vector<32x128xf32> to vector<32x128xbf16>
    %c0_6 = arith.constant 0 : index
    %c0_7 = arith.constant 0 : index
    %10 = vector.load %arg4[%c0_6, %c0_7] : memref<128x4xbf16, #tpu.memory_space<vmem>>, vector<128x4xbf16>
    %cst_8 = arith.constant dense<0.000000e+00> : vector<32x4xf32>
    %11 = tpu.matmul %9, %10, %cst_8 {dimension_numbers = #tpu.dot_dimension_numbers<[1], [0], [0], [1], [0, 0, 1, 1], [], []>} : vector<32x128xbf16>, vector<128x4xbf16>, vector<32x4xf32> -> vector<32x4xf32>
    %c0_9 = arith.constant 0 : index
    %c0_10 = arith.constant 0 : index
    %12 = vector.load %arg5[%c0_9, %c0_10] : memref<1x4xf32, #tpu.memory_space<vmem>>, vector<1x4xf32>
    %13 = vector.broadcast %12 : vector<1x4xf32> to vector<32x4xf32>
    %14 = arith.addf %11, %13 : vector<32x4xf32>
    %c0_11 = arith.constant 0 : index
    %c0_12 = arith.constant 0 : index
    %15 = vector.load %arg6[%c0_11, %c0_12] : memref<32x4xf32, #tpu.memory_space<vmem>>, vector<32x4xf32>
    tpu.vector_store %arg6[%c0_11, %c0_12], %14 {strides = array<i32>} : memref<32x4xf32, #tpu.memory_space<vmem>>, vector<32x4xf32>,
    return
  }
  func.func @transform_0(%arg0: i32) -> (i32, i32) {
    %c0_i32 = arith.constant 0 : i32
    %c0_i32_0 = arith.constant 0 : i32
    return %arg0, %c0_i32 : i32, i32
  }
  func.func @transform_1(%arg0: i32) -> (i32, i32) {
    %c0_i32 = arith.constant 0 : i32
    %c0_i32_0 = arith.constant 0 : i32
    %c0_i32_1 = arith.constant 0 : i32
    return %c0_i32, %c0_i32_0 : i32, i32
  }
  func.func @transform_2(%arg0: i32) -> (i32, i32) {
    %c0_i32 = arith.constant 0 : i32
    %c0_i32_0 = arith.constant 0 : i32
    %c0_i32_1 = arith.constant 0 : i32
    return %c0_i32, %c0_i32_0 : i32, i32
  }
  func.func @transform_3(%arg0: i32) -> (i32, i32) {
    %c0_i32 = arith.constant 0 : i32
    %c0_i32_0 = arith.constant 0 : i32
    %c0_i32_1 = arith.constant 0 : i32
    return %c0_i32, %c0_i32_0 : i32, i32
  }
  func.func @transform_4(%arg0: i32) -> (i32, i32) {
    %c0_i32 = arith.constant 0 : i32
    %c0_i32_0 = arith.constant 0 : i32
    %c0_i32_1 = arith.constant 0 : i32
    return %c0_i32, %c0_i32_0 : i32, i32
  }
  func.func @transform_5(%arg0: i32) -> (i32, i32) {
    %c0_i32 = arith.constant 0 : i32
    %c0_i32_0 = arith.constant 0 : i32
    return %arg0, %c0_i32 : i32, i32
  }
}

</mosaic_0001>

<bundles_post_ra>
// kernel: nn_forward.1
= control target key start
LH: loop header
LB: loop body
LE: loop exit
PB: predicated region body
PF: predicated region fallthrough
CT: control target
= control target key end

     0   :  { %vm39_vm0 = vcmask 1043456   ;;  %vm32_vm1 = vcmask 64512   ;;  %vm155_vm2 = vcmask 31744   ;;  %s305_s1 = inlined_call_operand.vmem [shape: bf16[8,128], index: 1, kind: input, shape index: {}]   ;;  %s306_s0 = inlined_call_operand.vmem [shape: f32[32,8], index: 0, kind: input, shape index: {}]   ;;  %s307_s3 = inlined_call_operand.vmem [shape: bf16[128,4], index: 3, kind: input, shape index: {}]   ;;  %s308_s2 = inlined_call_operand.vmem [shape: f32[1,128], index: 2, kind: input, shape index: {}]   ;;  %s309_s4 = inlined_call_operand.vmem [shape: f32[1,4], index: 4, kind: input, shape index: {}]   ;;  %s310_s5 = inlined_call_operand.vmem [shape: f32[32,4], index: 5, kind: output, shape index: {}]  }
   0x1   :  { %v27_v0 = vld [vmem:[%s305_s1] sm:$0xf]  ;;  %v22_v2 = vld [vmem:[%s306_s0 + $0x8] sm:$0xff]  ;;  %v205_v5 = vld [vmem:[%s307_s3 + $0x38] sm:$0xff] }
   0x2   :  { %v21_v1 = vld [vmem:[%s306_s0] sm:$0xff]  ;;  %v41_v3 = vsel %vm39_vm0, %v27_v0, 0  ;;  %136 = vmatpush.bf16.msra.mxu1 %v205_v5  ;;  %v204_v6 = vld [vmem:[%s307_s3 + $0x30] sm:$0xff]  ;;  %206 = vmatpush.bf16.msra.mxu2 %v205_v5  ;;  %v203_v7 = vld [vmem:[%s307_s3 + $0x28] sm:$0xff] }
   0x3   :  { %v25_v4 = vpack.c.bf16 %v22_v2, %v21_v1  ;;  %50 = vmatpush.bf16.msra.mxu0 %v41_v3  ;;  %v202_v8 = vld [vmem:[%s307_s3 + $0x20] sm:$0xff]  ;;  %v23_v9 = vld [vmem:[%s306_s0 + $0x10] sm:$0xff]  ;;  %v24_v10 = vld [vmem:[%s306_s0 + $0x18] sm:$0xff] }
   0x4   :  { %v26_v11 = vpack.c.bf16 %v24_v10, %v23_v9  ;;  %v201_v12 = vld [vmem:[%s307_s3 + $0x18] sm:$0xff]  ;;  %v200_v13 = vld [vmem:[%s307_s3 + $0x10] sm:$0xff]  ;;  %v199_v14 = vld [vmem:[%s307_s3 + $0x8] sm:$0xff] }
   0x5   :  { %v198_v15 = vld [vmem:[%s307_s3] sm:$0xff] }
   0x6   :  { %164 = vmatmul.msk.bf16.vlgmr.msra.gmra.mxu0 %vm32_vm1, %v25_v4  ;;  %137 = vmatpush.bf16.msra.mxu1 %v204_v6  ;;  %v214_v17 = vld [vmem:[%s308_s2] ss:$0 sm:$0xff] }
   0x7   :  { %207 = vmatpush.bf16.msra.mxu2 %v204_v6  ;;  %v215_v31 = vld [vmem:[%s309_s4] ss:$0 sm:$0xff] }
   0xa   :  { %138 = vmatpush.bf16.msra.mxu1 %v203_v7 }
   0xb   :  { %208 = vmatpush.bf16.msra.mxu2 %v203_v7 }
   0xe   :  { %139 = vmatpush.bf16.msra.mxu1 %v202_v8 }
   0xf   :  { %209 = vmatpush.bf16.msra.mxu2 %v202_v8 }
  0x12   :  { %140 = vmatpush.bf16.msra.mxu1 %v201_v12 }
  0x13   :  { %210 = vmatpush.bf16.msra.mxu2 %v201_v12 }
  0x16   :  { %165 = vmatmul.msk.bf16.gmra.mxu0 %vm32_vm1, %v26_v11  ;;  %141 = vmatpush.bf16.msra.mxu1 %v200_v13 }
  0x17   :  { %211 = vmatpush.bf16.msra.mxu2 %v200_v13 }
  0x1a   :  { %142 = vmatpush.bf16.msra.mxu1 %v199_v14 }
  0x1b   :  { %212 = vmatpush.bf16.msra.mxu2 %v199_v14 }
  0x1e   :  { %143 = vmatpush.bf16.msra.mxu1 %v198_v15 }
  0x1f   :  { %213 = vmatpush.bf16.msra.mxu2 %v198_v15 }
  0x83   :  { %v52_v16 = vpop.f32.mrf.mxu0 }
  0x84   :  { %v53_v18 = vadd.f32 %v214_v17, %v52_v16 }
  0x86   :  { %v62_v21 = vmax.f32 %v53_v18, 0.0 }
  0x8b   :  { %v54_v19 = vpop.f32.mrf.mxu0 }
  0x8c   :  { %v55_v20 = vadd.f32 %v214_v17, %v54_v19 }
  0x8e   :  { %v63_v22 = vmax.f32 %v55_v20, 0.0 }
  0x90   :  { %v66_v23 = vpack.c.bf16 %v63_v22, %v62_v21 }
  0x92   :  { %144 = vmatmul.bf16.vlgmr.msra.gmra.mxu1 %v66_v23 }
  0x93   :  { %v57_v24 = vpop.f32.mrf.mxu0 }
  0x94   :  { %v58_v25 = vadd.f32 %v214_v17, %v57_v24 }
  0x96   :  { %v64_v28 = vmax.f32 %v58_v25, 0.0 }
  0x9b   :  { %v59_v26 = vpop.f32.mrf.mxu0 }
  0x9c   :  { %v60_v27 = vadd.f32 %v214_v17, %v59_v26 }
  0x9e   :  { %v65_v29 = vmax.f32 %v60_v27, 0.0 }
  0xa0   :  { %v67_v30 = vpack.c.bf16 %v65_v29, %v64_v28 }
  0xa2   :  { %149 = vmatmul.bf16.vlgmr.msra.gmra.mxu2 %v67_v30 }
 0x10f   :  { %v145_v32 = vpop.f32.mrf.mxu1 }
 0x110   :  { %v146_v33 = vadd.f32 %v215_v31, %v145_v32 }
 0x112   :  { %156 = vst.msk [vmem:[%s310_s5] sm:$0xff] %vm155_vm2, %v146_v33 }
 0x117   :  { %v147_v34 = vpop.f32.mrf.mxu1 }
 0x118   :  { %v148_v35 = vadd.f32 %v215_v31, %v147_v34 }
 0x11a   :  { %157 = vst.msk [vmem:[%s310_s5 + $0x8] sm:$0xff] %vm155_vm2, %v148_v35 }
 0x125   :  { %v150_v36 = vpop.f32.mrf.mxu2 }
 0x126   :  { %v151_v37 = vadd.f32 %v215_v31, %v150_v36 }
 0x128   :  { %158 = vst.msk [vmem:[%s310_s5 + $0x10] sm:$0xff] %vm155_vm2, %v151_v37 }
 0x12d   :  { %v152_v38 = vpop.f32.mrf.mxu2 }
 0x12e   :  { %v153_v39 = vadd.f32 %v215_v31, %v152_v38 }
 0x130   :  { %159 = vst.msk [vmem:[%s310_s5 + $0x18] sm:$0xff] %vm155_vm2, %v153_v39 }

</bundles_post_ra>
